<compile_context>
chip_gen: v5e
topology: v5e:2x2
jax: 0.10.0
libtpu: 0.0.40
codegen_flags: <defaults>
</compile_context>

<pallas_src>
import jax
import jax.numpy as jnp
from jax.experimental import pallas as pl
from jax.experimental.pallas import tpu as pltpu

_LANE = 128
_SUBLANE = 8
_VMEM_TILE_BUDGET = 28 << 20   # bytes budgeted for the per-batch-tile working set
_K_RESIDENT_MAX = 8192         # keep W1 fully resident up to this input_dim
_K_SPLIT_TILE = 2048           # K-slab size (multiple of 128) when input_dim is huge


def _round_up(n, m):
    return ((n + m - 1) // m) * m


def _choose_k_tile(d_in):
    """K (=input_dim) tile for the first matmul: resident W1 when small, split when huge."""
    if d_in <= _K_RESIDENT_MAX:
        return d_in            # single K step; block dim == full array dim, no padding
    return _K_SPLIT_TILE


def _min_parallel_steps():
    """>=4 'parallel' grid steps only on multi-TensorCore parts (v7x); else 1."""
    try:
        kind = jax.devices()[0].device_kind.lower()
    except Exception:
        return 1
    return 4 if ("v7" in kind or "7x" in kind) else 1


def mlp_kernel(x_ref, w1_ref, b1_ref, w2_ref, b2_ref, w3_ref, b3_ref,
               y_ref, h2_ref, h1_acc):
    # x: (TM, TK) f32; weights bf16; biases f32.  Bias/ReLU math stays on the f32
    # accumulator; activations are cast to bf16 only to feed the next matmul.
    k = pl.program_id(1)

    @pl.when(k == 0)
    def _():
        h1_acc[...] = jnp.zeros_like(h1_acc)

    # First matmul, accumulated in f32 over the (possibly split) K axis.
    x = x_ref[...].astype(jnp.bfloat16)          # VPU cast; x arrives as raw f32
    h1_acc[...] += jnp.dot(x, w1_ref[...], preferred_element_type=jnp.float32)

    @pl.when(k == pl.num_programs(1) - 1)
    def _():
        h1 = jnp.maximum(h1_acc[...] + b1_ref[...], 0.0)
        h2 = jnp.dot(h1.astype(w2_ref.dtype), w2_ref[...],
                     preferred_element_type=jnp.float32) + b2_ref[...]
        h2 = jnp.maximum(h2, 0.0)
        y = jnp.dot(h2.astype(w3_ref.dtype), w3_ref[...],
                    preferred_element_type=jnp.float32) + b3_ref[...]
        y_ref[...] = y.astype(y_ref.dtype)
        h2_ref[...] = h2.astype(h2_ref.dtype)


def prepare_params(params):
    """One-time conversion of params for the kernel (hoisted out of the hot path):
    weights -> bf16 stored (in, out); biases -> f32 (1, N); W1 zero-padded on its K
    dim only if the K axis has to be split (very large input_dim)."""
    w1, b1, w2, b2, w3, b3 = params
    d_in = w1.shape[0]
    d_in_p = _round_up(d_in, _choose_k_tile(d_in))
    w1p = jnp.pad(jnp.asarray(w1, jnp.bfloat16), ((0, d_in_p - d_in), (0, 0)))
    return (w1p,
            jnp.asarray(b1, jnp.float32).reshape(1, -1),
            jnp.asarray(w2, jnp.bfloat16),
            jnp.asarray(b2, jnp.float32).reshape(1, -1),
            jnp.asarray(w3, jnp.bfloat16),
            jnp.asarray(b3, jnp.float32).reshape(1, -1))


def mlp_forward(x, prepared_params, *, block_batch=4096):
    """x: (B, ...) -> (y_pred (B, out_dim) f32, h_2 (B, 100) f32).
    `prepared_params` must come from prepare_params()."""
    w1, b1, w2, b2, w3, b3 = prepared_params
    B = x.shape[0]
    x_flat = x.reshape(B, -1).astype(jnp.float32)          # x.view(batch_size, -1)
    d_in = x_flat.shape[1]

    d_in_p, h1_dim = w1.shape
    h2_dim = w2.shape[1]
    out_dim = w3.shape[1]

    # ---- K (input_dim) tiling ----
    tk = _choose_k_tile(d_in)
    assert d_in_p == _round_up(d_in, tk), "params were not prepared for this input width"
    nk = d_in_p // tk
    if d_in_p > d_in:
        # Only reached for very large input_dim (K split); zero padding is exact.
        x_flat = jnp.pad(x_flat, ((0, 0), (0, d_in_p - d_in)))

    # ---- Batch tiling: biggest multiple-of-8 tile within the VMEM budget ----
    h1_l = _round_up(h1_dim, _LANE)    # internal lane padding of VMEM buffers
    h2_l = _round_up(h2_dim, _LANE)
    out_l = _round_up(out_dim, _LANE)
    per_row = (2 * 4 * tk              # x tile (f32, double buffered)
               + 2 * 2 * tk            # in-kernel bf16 copy of the x tile
               + 4 * h1_l              # f32 h1 accumulator scratch
               + 4 * h1_l              # f32 h1 temp (bias + relu)
               + 2 * 4 * out_l         # y output buffers
               + 2 * 4 * h2_l          # h2 output buffers
               + 4 * h2_l + 4 * out_l + 2 * (h1_l + h2_l))   # f32/bf16 temps slop
    b8 = _round_up(B, _SUBLANE)
    tm_cap = max(_SUBLANE, (_VMEM_TILE_BUDGET // per_row) // _SUBLANE * _SUBLANE)
    tm = max(_SUBLANE, (min(block_batch, tm_cap, b8) // _SUBLANE) * _SUBLANE)
    nb = -(-b8 // tm)
    min_steps = _min_parallel_steps()
    if b8 >= min_steps * _SUBLANE:
        nb = max(nb, min_steps)        # only >1 on v7x (2 TensorCores)
    tm = _round_up(-(-b8 // nb), _SUBLANE)   # near-equal tiles: overshoot < 8*nb rows
    b_p = nb * tm
    if b_p > B:
        x_flat = jnp.pad(x_flat, ((0, b_p - B), (0, 0)))

    # ---- VMEM / cost bookkeeping ----
    weight_bytes = (2 * (tk * h1_dim + h1_dim * h2_dim + h2_dim * out_dim)
                    + 4 * (h1_l + h2_l + out_l))
    vmem_need = tm * per_row + 2 * weight_bytes + (2 << 20)
    vmem_limit = int(min(max(vmem_need * 5 // 4, 32 << 20), 48 << 20))
    flops = 2 * b_p * (d_in_p * h1_dim + h1_dim * h2_dim + h2_dim * out_dim)
    bytes_accessed = (b_p * d_in_p * 4 + weight_bytes
                      + b_p * (out_dim + h2_dim) * 4)

    resident = lambda i, k: (0, 0)

    y, h2 = pl.pallas_call(
        mlp_kernel,
        out_shape=(
            jax.ShapeDtypeStruct((b_p, out_dim), jnp.float32),
            jax.ShapeDtypeStruct((b_p, h2_dim), jnp.float32),
        ),
        grid_spec=pltpu.PrefetchScalarGridSpec(
            num_scalar_prefetch=0,
            grid=(b_p // tm, nk),
            in_specs=[
                pl.BlockSpec((tm, tk), lambda i, k: (i, k)),       # x (raw f32)
                pl.BlockSpec((tk, h1_dim), lambda i, k: (k, 0)),   # W1 K-slab
                pl.BlockSpec((1, h1_dim), resident),               # b1
                pl.BlockSpec((h1_dim, h2_dim), resident),          # W2 (resident)
                pl.BlockSpec((1, h2_dim), resident),               # b2
                pl.BlockSpec((h2_dim, out_dim), resident),         # W3 (resident)
                pl.BlockSpec((1, out_dim), resident),              # b3
            ],
            out_specs=[
                pl.BlockSpec((tm, out_dim), lambda i, k: (i, 0)),  # y_pred, true width
                pl.BlockSpec((tm, h2_dim), lambda i, k: (i, 0)),   # h_2, true width
            ],
            scratch_shapes=[pltpu.VMEM((tm, h1_dim), jnp.float32)],
        ),
        compiler_params=pltpu.CompilerParams(
            dimension_semantics=("parallel", "arbitrary"),
            vmem_limit_bytes=vmem_limit,
        ),
        cost_estimate=pl.CostEstimate(
            flops=flops, transcendentals=0, bytes_accessed=bytes_accessed),
    )(x_flat, w1, b1, w2, b2, w3, b3)

    # Only padded *rows* (if any) need slicing; columns are already the true widths.
    if b_p > B:
        y, h2 = y[:B], h2[:B]
    return y, h2
    # TODO(synk): optionally store h_2 (and y) as bf16 to halve writeback further if a
    # downstream consumer tolerates the extra rounding.


def init_params(key, input_dim, output_dim):
    """Deterministic init matching nn.Linear shapes (stored transposed: (in, out))."""
    dims = [(input_dim, 250), (250, 100), (100, output_dim)]
    params = []
    for i, (d_in, d_out) in enumerate(dims):
        kw, kb = jax.random.split(jax.random.fold_in(key, i))
        bound = 1.0 / (d_in ** 0.5)               # PyTorch default uniform bound
        w = jax.random.uniform(kw, (d_in, d_out), jnp.float32, -bound, bound)
        b = jax.random.uniform(kb, (1, d_out), jnp.float32, -bound, bound)
        params.extend([w, b])
    return tuple(params)


def mlp_reference(x, params):
    """Plain-JAX f32 reference for correctness check."""
    w1, b1, w2, b2, w3, b3 = params
    xf = x.reshape(x.shape[0], -1)
    h1 = jnp.maximum(xf @ w1 + b1, 0.0)
    h2 = jnp.maximum(h1 @ w2 + b2, 0.0)
    return h2 @ w3 + b3, h2


if __name__ == "__main__":
    key = jax.random.PRNGKey(0)
    k_x, k_p = jax.random.split(key)

    # Small shapes: batch=2, image 1x8x8 -> input_dim=64, output_dim=10.
    B, C, H, W = 2, 1, 8, 8
    input_dim, output_dim = C * H * W, 10

    x = jax.random.normal(k_x, (B, C, H, W), jnp.float32)
    params = init_params(k_p, input_dim, output_dim)
    dev_params = prepare_params(params)            # one-time, outside the hot path

    y, h2 = jax.jit(mlp_forward)(x, dev_params)
    jax.block_until_ready((y, h2))

    y_ref, h2_ref = mlp_reference(x, params)
    assert y.shape == (B, output_dim) and h2.shape == (B, 100)
    # bf16 matmul inputs -> loose tolerance vs. the pure-f32 reference.
    assert jnp.allclose(y, y_ref, atol=5e-2, rtol=5e-2), float(jnp.max(jnp.abs(y - y_ref)))
    assert jnp.allclose(h2, h2_ref, atol=5e-2, rtol=5e-2), float(jnp.max(jnp.abs(h2 - h2_ref)))

    print("KERNEL_OK")
</pallas_src>

<mosaic_0001>
module attributes {stable_mosaic.version = 11 : i64} {
  func.func @mlp_kernel(%arg0: i32, %arg1: i32, %arg2: memref<8x64xf32, #tpu.memory_space<vmem>>, %arg3: memref<64x250xbf16, #tpu.memory_space<vmem>>, %arg4: memref<1x250xf32, #tpu.memory_space<vmem>>, %arg5: memref<250x100xbf16, #tpu.memory_space<vmem>>, %arg6: memref<1x100xf32, #tpu.memory_space<vmem>>, %arg7: memref<100x10xbf16, #tpu.memory_space<vmem>>, %arg8: memref<1x10xf32, #tpu.memory_space<vmem>>, %arg9: memref<8x10xf32, #tpu.memory_space<vmem>>, %arg10: memref<8x100xf32, #tpu.memory_space<vmem>>, %arg11: memref<8x250xf32, #tpu.memory_space<vmem>>) attributes {dimension_semantics = [#tpu.dimension_semantics<parallel>, #tpu.dimension_semantics<arbitrary>], iteration_bounds = array<i64: 1, 1>, scalar_prefetch = 0 : i64, scratch_operands = 1 : i64, tpu.core_type = #tpu.core_type<tc>, window_params = [{transform_indices = @transform_0, window_bounds = array<i64: 8, 64>}, {transform_indices = @transform_1, window_bounds = array<i64: 64, 250>}, {pipeline_mode = #tpu.pipeline_mode<synchronous>, transform_indices = @transform_2, window_bounds = array<i64: 1, 250>}, {pipeline_mode = #tpu.pipeline_mode<synchronous>, transform_indices = @transform_3, window_bounds = array<i64: 250, 100>}, {pipeline_mode = #tpu.pipeline_mode<synchronous>, transform_indices = @transform_4, window_bounds = array<i64: 1, 100>}, {pipeline_mode = #tpu.pipeline_mode<synchronous>, transform_indices = @transform_5, window_bounds = array<i64: 100, 10>}, {pipeline_mode = #tpu.pipeline_mode<synchronous>, transform_indices = @transform_6, window_bounds = array<i64: 1, 10>}, {transform_indices = @transform_7, window_bounds = array<i64: 8, 10>}, {transform_indices = @transform_8, window_bounds = array<i64: 8, 100>}]} {
    %c0_i32 = arith.constant 0 : i32
    %0 = arith.cmpi eq, %arg1, %c0_i32 : i32
    %1 = arith.extui %0 : i1 to i32
    %c0_i32_0 = arith.constant 0 : i32
    %2 = arith.cmpi ne, %1, %c0_i32_0 : i32
    scf.if %2 {
      %cst_10 = arith.constant 0.000000e+00 : f32
      %13 = vector.broadcast %cst_10 : f32 to vector<8x250xf32>
      %c0_11 = arith.constant 0 : index
      %c0_12 = arith.constant 0 : index
      %14 = vector.load %arg11[%c0_11, %c0_12] : memref<8x250xf32, #tpu.memory_space<vmem>>, vector<8x250xf32>
      tpu.vector_store %arg11[%c0_11, %c0_12], %13 {strides = array<i32>} : memref<8x250xf32, #tpu.memory_space<vmem>>, vector<8x250xf32>,
    } else {
    }
    %c0 = arith.constant 0 : index
    %c0_1 = arith.constant 0 : index
    %3 = vector.load %arg2[%c0, %c0_1] : memref<8x64xf32, #tpu.memory_space<vmem>>, vector<8x64xf32>
    %4 = arith.truncf %3 : vector<8x64xf32> to vector<8x64xbf16>
    %c0_2 = arith.constant 0 : index
    %c0_3 = arith.constant 0 : index
    %5 = vector.load %arg11[%c0_2, %c0_3] : memref<8x250xf32, #tpu.memory_space<vmem>>, vector<8x250xf32>
    %c0_4 = arith.constant 0 : index
    %c0_5 = arith.constant 0 : index
    %6 = vector.load %arg3[%c0_4, %c0_5] : memref<64x250xbf16, #tpu.memory_space<vmem>>, vector<64x250xbf16>
    %cst = arith.constant dense<0.000000e+00> : vector<8x250xf32>
    %7 = tpu.matmul %4, %6, %cst {dimension_numbers = #tpu.dot_dimension_numbers<[1], [0], [0], [1], [0, 0, 1, 1], [], []>} : vector<8x64xbf16>, vector<64x250xbf16>, vector<8x250xf32> -> vector<8x250xf32>
    %8 = arith.addf %5, %7 : vector<8x250xf32>
    %c0_6 = arith.constant 0 : index
    %c0_7 = arith.constant 0 : index
    %9 = vector.load %arg11[%c0_6, %c0_7] : memref<8x250xf32, #tpu.memory_space<vmem>>, vector<8x250xf32>
    tpu.vector_store %arg11[%c0_6, %c0_7], %8 {strides = array<i32>} : memref<8x250xf32, #tpu.memory_space<vmem>>, vector<8x250xf32>,
    %c0_i32_8 = arith.constant 0 : i32
    %10 = arith.cmpi eq, %arg1, %c0_i32_8 : i32
    %11 = arith.extui %10 : i1 to i32
    %c0_i32_9 = arith.constant 0 : i32
    %12 = arith.cmpi ne, %11, %c0_i32_9 : i32
    scf.if %12 {
      %c0_10 = arith.constant 0 : index
      %c0_11 = arith.constant 0 : index
      %13 = vector.load %arg11[%c0_10, %c0_11] : memref<8x250xf32, #tpu.memory_space<vmem>>, vector<8x250xf32>
      %c0_12 = arith.constant 0 : index
      %c0_13 = arith.constant 0 : index
      %14 = vector.load %arg4[%c0_12, %c0_13] : memref<1x250xf32, #tpu.memory_space<vmem>>, vector<1x250xf32>
      %15 = vector.broadcast %14 : vector<1x250xf32> to vector<8x250xf32>
      %16 = arith.addf %13, %15 : vector<8x250xf32>
      %cst_14 = arith.constant 0.000000e+00 : f32
      %17 = vector.broadcast %cst_14 : f32 to vector<8x250xf32>
      %18 = arith.maximumf %16, %17 : vector<8x250xf32>
      %19 = arith.truncf %18 : vector<8x250xf32> to vector<8x250xbf16>
      %c0_15 = arith.constant 0 : index
      %c0_16 = arith.constant 0 : index
      %20 = vector.load %arg5[%c0_15, %c0_16] : memref<250x100xbf16, #tpu.memory_space<vmem>>, vector<250x100xbf16>
      %cst_17 = arith.constant dense<0.000000e+00> : vector<8x100xf32>
      %21 = tpu.matmul %19, %20, %cst_17 {dimension_numbers = #tpu.dot_dimension_numbers<[1], [0], [0], [1], [0, 0, 1, 1], [], []>} : vector<8x250xbf16>, vector<250x100xbf16>, vector<8x100xf32> -> vector<8x100xf32>
      %c0_18 = arith.constant 0 : index
      %c0_19 = arith.constant 0 : index
      %22 = vector.load %arg6[%c0_18, %c0_19] : memref<1x100xf32, #tpu.memory_space<vmem>>, vector<1x100xf32>
      %23 = vector.broadcast %22 : vector<1x100xf32> to vector<8x100xf32>
      %24 = arith.addf %21, %23 : vector<8x100xf32>
      %cst_20 = arith.constant 0.000000e+00 : f32
      %25 = vector.broadcast %cst_20 : f32 to vector<8x100xf32>
      %26 = arith.maximumf %24, %25 : vector<8x100xf32>
      %27 = arith.truncf %26 : vector<8x100xf32> to vector<8x100xbf16>
      %c0_21 = arith.constant 0 : index
      %c0_22 = arith.constant 0 : index
      %28 = vector.load %arg7[%c0_21, %c0_22] : memref<100x10xbf16, #tpu.memory_space<vmem>>, vector<100x10xbf16>
      %cst_23 = arith.constant dense<0.000000e+00> : vector<8x10xf32>
      %29 = tpu.matmul %27, %28, %cst_23 {dimension_numbers = #tpu.dot_dimension_numbers<[1], [0], [0], [1], [0, 0, 1, 1], [], []>} : vector<8x100xbf16>, vector<100x10xbf16>, vector<8x10xf32> -> vector<8x10xf32>
      %c0_24 = arith.constant 0 : index
      %c0_25 = arith.constant 0 : index
      %30 = vector.load %arg8[%c0_24, %c0_25] : memref<1x10xf32, #tpu.memory_space<vmem>>, vector<1x10xf32>
      %31 = vector.broadcast %30 : vector<1x10xf32> to vector<8x10xf32>
      %32 = arith.addf %29, %31 : vector<8x10xf32>
      %c0_26 = arith.constant 0 : index
      %c0_27 = arith.constant 0 : index
      %33 = vector.load %arg9[%c0_26, %c0_27] : memref<8x10xf32, #tpu.memory_space<vmem>>, vector<8x10xf32>
      tpu.vector_store %arg9[%c0_26, %c0_27], %32 {strides = array<i32>} : memref<8x10xf32, #tpu.memory_space<vmem>>, vector<8x10xf32>,
      %c0_28 = arith.constant 0 : index
      %c0_29 = arith.constant 0 : index
      %34 = vector.load %arg10[%c0_28, %c0_29] : memref<8x100xf32, #tpu.memory_space<vmem>>, vector<8x100xf32>
      tpu.vector_store %arg10[%c0_28, %c0_29], %26 {strides = array<i32>} : memref<8x100xf32, #tpu.memory_space<vmem>>, vector<8x100xf32>,
    } else {
    }
    return
  }
  func.func @transform_0(%arg0: i32, %arg1: i32) -> (i32, i32) {
    %c0_i32 = arith.constant 0 : i32
    return %arg0, %arg1 : i32, i32
  }
  func.func @transform_1(%arg0: i32, %arg1: i32) -> (i32, i32) {
    %c0_i32 = arith.constant 0 : i32
    %c0_i32_0 = arith.constant 0 : i32
    return %arg1, %c0_i32 : i32, i32
  }
  func.func @transform_2(%arg0: i32, %arg1: i32) -> (i32, i32) {
    %c0_i32 = arith.constant 0 : i32
    %c0_i32_0 = arith.constant 0 : i32
    %c0_i32_1 = arith.constant 0 : i32
    return %c0_i32, %c0_i32_0 : i32, i32
  }
  func.func @transform_3(%arg0: i32, %arg1: i32) -> (i32, i32) {
    %c0_i32 = arith.constant 0 : i32
    %c0_i32_0 = arith.constant 0 : i32
    %c0_i32_1 = arith.constant 0 : i32
    return %c0_i32, %c0_i32_0 : i32, i32
  }
  func.func @transform_4(%arg0: i32, %arg1: i32) -> (i32, i32) {
    %c0_i32 = arith.constant 0 : i32
    %c0_i32_0 = arith.constant 0 : i32
    %c0_i32_1 = arith.constant 0 : i32
    return %c0_i32, %c0_i32_0 : i32, i32
  }
  func.func @transform_5(%arg0: i32, %arg1: i32) -> (i32, i32) {
    %c0_i32 = arith.constant 0 : i32
    %c0_i32_0 = arith.constant 0 : i32
    %c0_i32_1 = arith.constant 0 : i32
    return %c0_i32, %c0_i32_0 : i32, i32
  }
  func.func @transform_6(%arg0: i32, %arg1: i32) -> (i32, i32) {
    %c0_i32 = arith.constant 0 : i32
    %c0_i32_0 = arith.constant 0 : i32
    %c0_i32_1 = arith.constant 0 : i32
    return %c0_i32, %c0_i32_0 : i32, i32
  }
  func.func @transform_7(%arg0: i32, %arg1: i32) -> (i32, i32) {
    %c0_i32 = arith.constant 0 : i32
    %c0_i32_0 = arith.constant 0 : i32
    return %arg0, %c0_i32 : i32, i32
  }
  func.func @transform_8(%arg0: i32, %arg1: i32) -> (i32, i32) {
    %c0_i32 = arith.constant 0 : i32
    %c0_i32_0 = arith.constant 0 : i32
    return %arg0, %c0_i32 : i32, i32
  }
}

</mosaic_0001>

<bundles_post_ra>
// kernel: mlp_forward.1
= control target key start
LH: loop header
LB: loop body
LE: loop exit
PB: predicated region body
PF: predicated region fallthrough
CT: control target
= control target key end

     0   :  { %vm88_vm0 = vcmask 523264   ;;  %vm274_vm1 = vcmask 1044480   ;;  %vm34_vm2 = vcmask 998400   ;;  %v551_v40 = vmov 0.0   ;;  %s740_s1 = inlined_call_operand.vmem [shape: bf16[64,250], index: 1, kind: input, shape index: {}]   ;;  %s741_s3 = inlined_call_operand.vmem [shape: bf16[250,100], index: 3, kind: input, shape index: {}]   ;;  %s742_s0 = inlined_call_operand.vmem [shape: f32[8,64], index: 0, kind: input, shape index: {}]   ;;  %s743_s4 = inlined_call_operand.vmem [shape: f32[1,100], index: 4, kind: input, shape index: {}]   ;;  %s744_s2 = inlined_call_operand.vmem [shape: f32[1,250], index: 2, kind: input, shape index: {}]   ;;  %s745_s5 = inlined_call_operand.vmem [shape: bf16[100,10], index: 5, kind: input, shape index: {}]   ;;  %s746_s6 = inlined_call_operand.vmem [shape: f32[1,10], index: 6, kind: input, shape index: {}]   ;;  %s747_s8 = inlined_call_operand.vmem [shape: f32[8,100], index: 8, kind: output, shape index: {1}]   ;;  %s748_s7 = inlined_call_operand.vmem [shape: f32[8,10], index: 7, kind: output, shape index: {0}]  }
   0x1   :  { %v420_v0 = vld [vmem:[%s740_s1 + $0x30] sm:$0xf]  ;;  %v525_v1 = vld [vmem:[%s740_s1 + $0x34] sm:$0xf0]  ;;  %v412_v2 = vld [vmem:[%s740_s1 + $0x20] sm:$0xf] }
   0x2   :  { %v421_v3 = vor.u32 %v525_v1, %v420_v0  ;;  %v523_v4 = vld [vmem:[%s740_s1 + $0x24] sm:$0xf0]  ;;  %v404_v6 = vld [vmem:[%s740_s1 + $0x10] sm:$0xf]  ;;  %v521_v7 = vld [vmem:[%s740_s1 + $0x14] sm:$0xf0] }
   0x3   :  { %v413_v5 = vor.u32 %v523_v4, %v412_v2  ;;  %v533_v8 = vld [vmem:[%s741_s3 + $0x38] sm:$0xff]  ;;  %v405_v9 = vor.u32 %v521_v7, %v404_v6  ;;  %v532_v10 = vld [vmem:[%s741_s3 + $0x30] sm:$0xff]  ;;  %v396_v11 = vld [vmem:[%s740_s1] sm:$0xf]  ;;  %35 = vst.msk [vmem:[#allocation2 + $0x8] sm:$0xff] %vm34_vm2, %v551_v40  ;;  %vm366_vm3 = vcmask 1041408  }
   0x4   :  { %96 = vmatpush.bf16.msra.mxu1 %v421_v3  ;;  %278 = vmatpush.bf16.msra.mxu2 %v533_v8  ;;  %v519_v12 = vld [vmem:[%s740_s1 + $0x4] sm:$0xf0]  ;;  %v524_v13 = vld [vmem:[%s740_s1 + $0x34] sm:$0xf]  ;;  %v422_v14 = vld [vmem:[%s740_s1 + $0x38] sm:$0xf0] }
   0x5   :  { %v397_v15 = vor.u32 %v519_v12, %v396_v11  ;;  %v36_v16 = vld [vmem:[%s742_s0] sm:$0xff]  ;;  %v531_v17 = vld [vmem:[%s741_s3 + $0x28] sm:$0xff]  ;;  %v425_v18 = vor.u32 %v524_v13, %v422_v14  ;;  %v520_v24 = vld [vmem:[%s740_s1 + $0x14] sm:$0xf]  ;;  %vm362_vm4 = vcmask 818176   ;;  %vm383_vm5 = vcmask 80896  }
   0x6   :  { %v522_v19 = vld [vmem:[%s740_s1 + $0x24] sm:$0xf]  ;;  %v414_v20 = vld [vmem:[%s740_s1 + $0x28] sm:$0xf0]  ;;  %v37_v21 = vpack.c.bf16 %v36_v16, %v36_v16  ;;  %v406_v25 = vld [vmem:[%s740_s1 + $0x18] sm:$0xf0] }
   0x7   :  { %v530_v22 = vld [vmem:[%s741_s3 + $0x20] sm:$0xff]  ;;  %v417_v23 = vor.u32 %v522_v19, %v414_v20  ;;  %v409_v26 = vor.u32 %v520_v24, %v406_v25  ;;  %v398_v28 = vld [vmem:[%s740_s1 + $0x8] sm:$0xf0]  ;;  %v529_v30 = vld [vmem:[%s741_s3 + $0x18] sm:$0xff] }
   0x8   :  { %97 = vmatpush.bf16.msra.mxu1 %v413_v5  ;;  %279 = vmatpush.bf16.msra.mxu2 %v532_v10  ;;  %v518_v27 = vld [vmem:[%s740_s1 + $0x4] sm:$0xf]  ;;  %v528_v31 = vld [vmem:[%s741_s3 + $0x10] sm:$0xff]  ;;  %v490_v32 = vld [vmem:[%s741_s3 + $0x78] sm:$0xf] }
   0x9   :  { %v401_v29 = vor.u32 %v518_v27, %v398_v28  ;;  %v541_v33 = vld [vmem:[%s741_s3 + $0x78] sm:$0x10]  ;;  %v527_v35 = vld [vmem:[%s741_s3 + $0x8] sm:$0xff]  ;;  %v540_v37 = vld [vmem:[%s741_s3 + $0x70] sm:$0xff] }
   0xa   :  { %v491_v34 = vor.u32 %v541_v33, %v490_v32  ;;  %v526_v38 = vld [vmem:[%s741_s3] sm:$0xff]  ;;  %v539_v39 = vld [vmem:[%s741_s3 + $0x68] sm:$0xff]  ;;  %v537_v42 = vld [vmem:[%s741_s3 + $0x58] sm:$0xff] }
   0xb   :  { %v538_v41 = vld [vmem:[%s741_s3 + $0x60] sm:$0xff]  ;;  %v536_v43 = vld [vmem:[%s741_s3 + $0x50] sm:$0xff]  ;;  %v535_v44 = vld [vmem:[%s741_s3 + $0x48] sm:$0xff] }
   0xc   :  { %98 = vmatpush.bf16.msra.mxu1 %v405_v9  ;;  %280 = vmatpush.bf16.msra.mxu2 %v531_v17  ;;  %v276_v36 = vsel %vm274_vm1, %v491_v34, 0  ;;  %v534_v45 = vld [vmem:[%s741_s3 + $0x40] sm:$0xff]  ;;  %v318_v49 = vld [vmem:[%s745_s5 + $0x30] sm:$0x3]  ;;  %v39_v57 = vld [vmem:[#allocation2 + $0x8] sm:$0xff] }
   0xd   :  { %291 = vmatpush.bf16.msra.mxu3 %v276_v36  ;;  %v128_v46 = vld [vmem:[%s744_s2] sm:$0x3]  ;;  %v348_v50 = vunpack.c.l.b16 %v318_v49  ;;  %v547_v2 = vld [vmem:[%s745_s5 + $0x28] sm:$0xff]  ;;  %v545_v4 = vld [vmem:[%s745_s5 + $0x18] sm:$0xff] }
   0xe   :  { %v130_v47 = vperm.slane %v128_v46, 0  ;;  %v131_v60 = vperm.slane %v128_v46, 1  ;;  %v546_v3 = vld [vmem:[%s745_s5 + $0x20] sm:$0xff]  ;;  %v544_v5 = vld [vmem:[%s745_s5 + $0x10] sm:$0xff]  ;;  %v543_v6 = vld [vmem:[%s745_s5 + $0x8] sm:$0xff] }
   0xf   :  { %v355_v52 = vpack.c.b16 %v348_v50, %v348_v50  ;;  %v542_v7 = vld [vmem:[%s745_s5] sm:$0xff] }
  0x10   :  { %99 = vmatpush.bf16.msra.mxu1 %v397_v15  ;;  %281 = vmatpush.bf16.msra.mxu2 %v530_v22  ;;  %v549_v10 = vld [vmem:[%s743_s4] ss:$0 sm:$0xff] }
  0x11   :  { %292 = vmatpush.bf16.msra.mxu3 %v540_v37  ;;  %v368_v54 = vsel %vm366_vm3, %v355_v52, 0  ;;  %v550_v17 = vld [vmem:[%s746_s6] ss:$0 sm:$0xff] }
  0x12   :  { %371 = vmatpush.bf16.msra.mxu0 %v368_v54 }
  0x13   :  { %426 = vmatmul.msk.bf16.vlgmr.msra.gmra.mxu1 %vm88_vm0, %v37_v21 }
  0x14   :  { %109 = vmatpush.bf16.msrb.mxu1 %v425_v18  ;;  %282 = vmatpush.bf16.msra.mxu2 %v529_v30 }
  0x15   :  { %293 = vmatpush.bf16.msra.mxu3 %v539_v39 }
  0x16   :  { %372 = vmatpush.bf16.msra.mxu0 %v547_v2 }
  0x18   :  { %110 = vmatpush.bf16.msrb.mxu1 %v417_v23  ;;  %283 = vmatpush.bf16.msra.mxu2 %v528_v31 }
  0x19   :  { %294 = vmatpush.bf16.msra.mxu3 %v538_v41 }
  0x1a   :  { %373 = vmatpush.bf16.msra.mxu0 %v546_v3 }
  0x1c   :  { %111 = vmatpush.bf16.msrb.mxu1 %v409_v26  ;;  %284 = vmatpush.bf16.msra.mxu2 %v527_v35 }
  0x1d   :  { %295 = vmatpush.bf16.msra.mxu3 %v537_v42 }
  0x1e   :  { %374 = vmatpush.bf16.msra.mxu0 %v545_v4 }
  0x20   :  { %112 = vmatpush.bf16.msrb.mxu1 %v401_v29  ;;  %285 = vmatpush.bf16.msra.mxu2 %v526_v38 }
  0x21   :  { %296 = vmatpush.bf16.msra.mxu3 %v536_v43 }
  0x22   :  { %375 = vmatpush.bf16.msra.mxu0 %v544_v5 }
  0x23   :  { %427 = vmatmul.msk.bf16.vlgmr.msrb.gmra.mxu1 %vm88_vm0, %v37_v21 }
  0x25   :  { %297 = vmatpush.bf16.msra.mxu3 %v535_v44 }
  0x26   :  { %376 = vmatpush.bf16.msra.mxu0 %v543_v6 }
  0x29   :  { %298 = vmatpush.bf16.msra.mxu3 %v534_v45 }
  0x2a   :  { %377 = vmatpush.bf16.msra.mxu0 %v542_v7 }
  0x90   :  { %v101_v48 = vpop.f32.mrf.mxu1 }
  0x91   :  { %v134_v51 = vadd.f32 %v130_v47, %v101_v48 }
  0x93   :  { %v136_v53 = vmax.f32 %v134_v51, 0.0 }
  0x95   :  { %v138_v55 = vpack.c.bf16 %v136_v53, %v136_v53 }
  0x97   :  { %286 = vmatmul.bf16.vlgmr.msra.gmra.mxu2 %v138_v55 }
  0x98   :  { %v103_v56 = vpop.f32.mrf.mxu1 }
  0xa0   :  { %v114_v58 = vpop.f32.mrf.mxu1 }
  0xa1   :  { %v119_v59 = vadd.f32 %v114_v58, %v39_v57 }
  0xa3   :  { %122 = vst.msk [vmem:[#allocation2 + $0x8] sm:$0xff] %vm34_vm2, %v119_v59 }
  0xa8   :  { %v116_v61 = vpop.f32.mrf.mxu1 }
  0xaa   :  { %v127_v62 = vld [vmem:[#allocation2 + $0x8] sm:$0xff] }
  0xab   :  { %v135_v63 = vadd.f32 %v131_v60, %v127_v62 }
  0xad   :  { %v137_v0 = vmax.f32 %v135_v63, 0.0 }
  0xaf   :  { %v139_v1 = vpack.c.bf16 %v137_v0, %v137_v0 }
  0xb1   :  { %492 = vmatmul.msk.bf16.vlgmr.msra.gmra.mxu3 %vm34_vm2, %v139_v1 }
 0x11a   :  { %v287_v8 = vpop.f32.mrf.mxu2 }
 0x11b   :  { %v288_v11 = vadd.f32 %v549_v10, %v287_v8 }
 0x122   :  { %v289_v9 = vpop.f32.mrf.mxu2 }
 0x134   :  { %v300_v12 = vpop.f32.mrf.mxu3 }
 0x135   :  { %v301_v13 = vadd.f32 %v300_v12, %v288_v11 }
 0x137   :  { %v304_v14 = vmax.f32 %v301_v13, 0.0 }
 0x139   :  { %v305_v15 = vpack.c.bf16 %v304_v14, %v304_v14  ;;  %385 = vst.msk [vmem:[%s747_s8] sm:$0xff] %vm362_vm4, %v304_v14 }
 0x13b   :  { %517 = vmatmul.msk.bf16.vlgmr.msra.gmra.mxu0 %vm362_vm4, %v305_v15 }
 0x13c   :  { %v302_v16 = vpop.f32.mrf.mxu3 }
 0x1b8   :  { %v379_v18 = vpop.f32.mrf.mxu0 }
 0x1b9   :  { %v380_v19 = vadd.f32 %v550_v17, %v379_v18 }
 0x1bb   :  { %384 = vst.msk [vmem:[%s748_s7] sm:$0xff] %vm383_vm5, %v380_v19 }
 0x1c0   :  { %v381_v20 = vpop.f32.mrf.mxu0 }

</bundles_post_ra>
